<compile_context>
chip_gen: v7x
topology: tpu7x:2x2x1
jax: 0.10.0
libtpu: 0.0.40
codegen_flags: <defaults>
</compile_context>

<pallas_src>
import functools

import jax
import jax.numpy as jnp
from jax.experimental import pallas as pl
from jax.experimental.pallas import tpu as pltpu


# ----------------------------------------------------------------------------
# Pallas conv kernel: one grid step per (image, row-tile).  For each of the K*K
# taps, an MXU matmul (TH*W, Cin) @ (Cin, Cout) accumulates into f32.
# ----------------------------------------------------------------------------
def _conv_kernel(x_ref, w_ref, b_ref, o_ref, *, TH, W, K, relu):
    x = x_ref[...]                    # (1, 1, TH+K-1, Wp, Cin)  bf16, padded
    b = b_ref[...]                    # (1, Cout)                f32
    cin = x.shape[-1]
    cout = o_ref.shape[-1]

    acc = None
    for ky in range(K):               # K*K static taps
        for kx in range(K):
            lhs = x[0, 0, ky:ky + TH, kx:kx + W, :].reshape(TH * W, cin)
            d = jnp.dot(lhs, w_ref[ky * K + kx],
                        preferred_element_type=jnp.float32)
            acc = d if acc is None else acc + d
    acc = acc + b                     # single hoisted bias broadcast
    if relu:
        acc = jnp.maximum(acc, 0.0)
    o_ref[...] = acc.reshape(1, 1, TH, W, cout)


def _pick_th(H, W, K, cin, cout):
    """Row-tile height: whole image if it fits a ~4 MiB tile budget, otherwise
    the smallest TH with TH*W >= 256 that stays under the budget."""
    def tile_bytes(t):
        return (t + K - 1) * (W + K - 1) * cin * 2 + t * W * cout * 4

    if tile_bytes(H) <= (4 << 20):
        return H
    th = min(H, max(1, -(-256 // W)))         # ceil(256 / W)
    while th > 1 and tile_bytes(th) > (4 << 20):
        th -= 1
    return th


def conv2d(x, w, b, *, reflect_pad, relu):
    """NHWC conv.  x:(N,H,W,Cin), w:(Cout,Cin,K,K) PyTorch layout, b:(Cout,)."""
    cout, cin, K, _ = w.shape
    x = x.astype(jnp.bfloat16)
    if reflect_pad and K > 1:
        p = (K - 1) // 2
        x = jnp.pad(x, ((0, 0), (p, p), (p, p), (0, 0)), mode="reflect")
    N, Hp, Wp, _ = x.shape
    Hout, Wout = Hp - (K - 1), Wp - (K - 1)

    TH = _pick_th(Hout, Wout, K, cin, cout)
    n_t = -(-Hout // TH)
    Hgrid = n_t * TH
    extra = (Hgrid + K - 1) - Hp              # bottom zero-pad so all tiles full
    if extra > 0:
        x = jnp.pad(x, ((0, 0), (0, extra), (0, 0), (0, 0)))

    if n_t == 1:
        tiles = x[:, None]                    # pure reshape, no halo copy
    else:                                     # overlapping row tiles (K-1 halo)
        tiles = jnp.stack(
            [x[:, j * TH: j * TH + TH + K - 1] for j in range(n_t)], axis=1)

    wt = jnp.transpose(w, (2, 3, 1, 0)).reshape(K * K, cin, cout).astype(jnp.bfloat16)
    bt = b.reshape(1, cout).astype(jnp.float32)

    out = pl.pallas_call(
        functools.partial(_conv_kernel, TH=TH, W=Wout, K=K, relu=relu),
        out_shape=jax.ShapeDtypeStruct((N, n_t, TH, Wout, cout), jnp.float32),
        grid=(N, n_t),
        in_specs=[
            pl.BlockSpec((1, 1, TH + K - 1, Wp, cin), lambda n, j: (n, j, 0, 0, 0)),
            pl.BlockSpec((K * K, cin, cout), lambda n, j: (0, 0, 0)),
            pl.BlockSpec((1, cout), lambda n, j: (0, 0)),
        ],
        out_specs=pl.BlockSpec((1, 1, TH, Wout, cout), lambda n, j: (n, j, 0, 0, 0)),
        compiler_params=pltpu.CompilerParams(
            dimension_semantics=("parallel", "parallel"),
            vmem_limit_bytes=48 * 1024 * 1024),
    )(tiles, wt, bt)

    out = out.reshape(N, Hgrid, Wout, cout)
    if Hgrid != Hout:
        out = out[:, :Hout]
    return out


# ----------------------------------------------------------------------------
# Plain-JAX glue ops (cheap, non-matmul) — all NHWC.
# ----------------------------------------------------------------------------
def maxpool2x2_nhwc(x):
    """2x2 max pool, stride 2, ceil_mode=True, NHWC."""
    N, H, W, C = x.shape
    if H % 2 or W % 2:
        x = jnp.pad(x, ((0, 0), (0, H % 2), (0, W % 2), (0, 0)),
                    constant_values=-jnp.inf)
    H2, W2 = x.shape[1] // 2, x.shape[2] // 2
    return x.reshape(N, H2, 2, W2, 2, C).max(axis=(2, 4))


def maxpool2x2_hw(x):
    """2x2 max pool over the last two axes (mask path, ceil_mode=True)."""
    lead = x.shape[:-2]
    H, W = x.shape[-2:]
    if H % 2 or W % 2:
        x = jnp.pad(x, [(0, 0)] * len(lead) + [(0, H % 2), (0, W % 2)],
                    constant_values=-jnp.inf)
    H, W = x.shape[-2:]
    return x.reshape(*lead, H // 2, 2, W // 2, 2).max(axis=(-3, -1))


def upsample2x_nhwc(x):
    """Nearest-neighbor x2 upsample, NHWC."""
    return jnp.repeat(jnp.repeat(x, 2, axis=1), 2, axis=2)


def calc_mean_std(feat, eps=1e-5):
    """Per (N, C) mean/std over spatial dims, NHWC, unbiased var (torch .var())."""
    N, H, W, C = feat.shape
    x = feat.reshape(N, H * W, C)
    mean = jnp.mean(x, axis=1).reshape(N, 1, 1, C)
    var = jnp.var(x, axis=1, ddof=1) + eps
    std = jnp.sqrt(var).reshape(N, 1, 1, C)
    return mean, std


def adain(content_feat, style_feat):
    style_mean, style_std = calc_mean_std(style_feat)
    content_mean, content_std = calc_mean_std(content_feat)
    normalized = (content_feat - content_mean) / content_std
    return normalized * style_std + style_mean


def mse(a, b):
    return jnp.mean((a - b) ** 2)


# ----------------------------------------------------------------------------
# Encoder / decoder definition (standard AdaIN VGG + decoder channel counts)
# ----------------------------------------------------------------------------
ENC_SHAPES = [  # (Cout, Cin, K)
    (3, 3, 1), (64, 3, 3),                      # enc_1
    (64, 64, 3), (128, 64, 3),                  # enc_2
    (128, 128, 3), (256, 128, 3),               # enc_3
    (256, 256, 3), (256, 256, 3), (256, 256, 3), (512, 256, 3),  # enc_4
]
DEC_SHAPES = [
    (256, 512, 3), (256, 256, 3), (256, 256, 3), (256, 256, 3),
    (128, 256, 3), (128, 128, 3), (64, 128, 3), (64, 64, 3), (3, 64, 3),
]


def init_params(key):
    p = {}
    for i, (co, ci, k) in enumerate(ENC_SHAPES):
        key, kw = jax.random.split(key)
        p[f"e{i}w"] = jax.random.normal(kw, (co, ci, k, k), jnp.float32) * jnp.sqrt(
            2.0 / (ci * k * k))
        p[f"e{i}b"] = jnp.zeros((co,), jnp.float32)
    for i, (co, ci, k) in enumerate(DEC_SHAPES):
        key, kw = jax.random.split(key)
        p[f"d{i}w"] = jax.random.normal(kw, (co, ci, k, k), jnp.float32) * jnp.sqrt(
            2.0 / (ci * k * k))
        p[f"d{i}b"] = jnp.zeros((co,), jnp.float32)
    return p


def enc_1(p, x):
    x = conv2d(x, p["e0w"], p["e0b"], reflect_pad=False, relu=False)  # 1x1 conv
    x = conv2d(x, p["e1w"], p["e1b"], reflect_pad=True, relu=True)    # relu1_1
    return x


def enc_2(p, x):
    x = conv2d(x, p["e2w"], p["e2b"], reflect_pad=True, relu=True)
    x = maxpool2x2_nhwc(x)
    x = conv2d(x, p["e3w"], p["e3b"], reflect_pad=True, relu=True)    # relu2_1
    return x


def enc_3(p, x):
    x = conv2d(x, p["e4w"], p["e4b"], reflect_pad=True, relu=True)
    x = maxpool2x2_nhwc(x)
    x = conv2d(x, p["e5w"], p["e5b"], reflect_pad=True, relu=True)    # relu3_1
    return x


def enc_4(p, x):
    x = conv2d(x, p["e6w"], p["e6b"], reflect_pad=True, relu=True)
    x = conv2d(x, p["e7w"], p["e7b"], reflect_pad=True, relu=True)
    x = conv2d(x, p["e8w"], p["e8b"], reflect_pad=True, relu=True)
    x = maxpool2x2_nhwc(x)
    x = conv2d(x, p["e9w"], p["e9b"], reflect_pad=True, relu=True)    # relu4_1
    return x


def encode_with_intermediate(p, x):
    results = [x]
    for fn in (enc_1, enc_2, enc_3, enc_4):
        results.append(fn(p, results[-1]))
    return results[1:]


def decoder(p, x):
    x = conv2d(x, p["d0w"], p["d0b"], reflect_pad=True, relu=True)
    x = upsample2x_nhwc(x)
    x = conv2d(x, p["d1w"], p["d1b"], reflect_pad=True, relu=True)
    x = conv2d(x, p["d2w"], p["d2b"], reflect_pad=True, relu=True)
    x = conv2d(x, p["d3w"], p["d3b"], reflect_pad=True, relu=True)
    x = conv2d(x, p["d4w"], p["d4b"], reflect_pad=True, relu=True)
    x = upsample2x_nhwc(x)
    x = conv2d(x, p["d5w"], p["d5b"], reflect_pad=True, relu=True)
    x = conv2d(x, p["d6w"], p["d6b"], reflect_pad=True, relu=True)
    x = upsample2x_nhwc(x)
    x = conv2d(x, p["d7w"], p["d7b"], reflect_pad=True, relu=True)
    x = conv2d(x, p["d8w"], p["d8b"], reflect_pad=True, relu=False)
    return x


# ----------------------------------------------------------------------------
# Generator forward (matches the PyTorch module semantics; NCHW in / NCHW out)
# ----------------------------------------------------------------------------
def stack_mask_dim(mask, n_channel, downsample_times):
    m = jnp.squeeze(mask, axis=1)              # NCHW mask -> (N, H, W)
    for _ in range(downsample_times):
        m = maxpool2x2_hw(m)
    return jnp.repeat(m[..., None], n_channel, axis=-1)   # (N, H', W', C)


def linear_combine_content_and_style(content, style, mask):
    m = stack_mask_dim(mask, 512, 3)
    inv = jnp.ones_like(m) - m
    return content * m + style * inv


def calc_weighted_content_loss(inp, target, weight):
    return jnp.mean(weight * (inp - target) ** 2)


def calc_style_loss(inp, target):
    im, isd = calc_mean_std(inp)
    tm, tsd = calc_mean_std(target)
    return mse(im, tm) + mse(isd, tsd)


def generator_forward(p, content, style, mask, alpha=1.0):
    assert 0.0 <= alpha <= 1.0
    args = [[64, 0], [128, 1], [256, 2], [512, 3]]

    # single NCHW -> NHWC transpose at the entry
    content_nhwc = jnp.transpose(content, (0, 2, 3, 1))
    style_nhwc = jnp.transpose(style, (0, 2, 3, 1))

    style_feats = encode_with_intermediate(p, style_nhwc)
    content_feats = encode_with_intermediate(p, content_nhwc)

    stylized_feat = adain(content_feats[-1], style_feats[-1])
    stylized_feat = alpha * stylized_feat + (1.0 - alpha) * content_feats[-1]
    combined = linear_combine_content_and_style(stylized_feat, style_feats[-1], mask)

    stylized_nhwc = decoder(p, combined)
    out_feats = encode_with_intermediate(p, stylized_nhwc)

    loss_c_fore, loss_c_back = 0.0, 0.0
    for i in range(4):
        m = stack_mask_dim(mask, args[i][0], args[i][1])
        inv = jnp.ones_like(m) - m
        loss_c_fore += calc_weighted_content_loss(out_feats[i], content_feats[i], m)
        loss_c_back += calc_weighted_content_loss(out_feats[i], style_feats[i], inv)

    loss_s = 0.0
    for i in range(4):
        loss_s += calc_style_loss(out_feats[i], style_feats[i])

    # TV loss in NHWC (axis 2 = W diff, axis 1 = H diff) — same sums as NCHW.
    tv_loss = (jnp.sum(jnp.abs(stylized_nhwc[:, :, 1:, :] - stylized_nhwc[:, :, :-1, :]))
               + jnp.sum(jnp.abs(stylized_nhwc[:, 1:, :, :] - stylized_nhwc[:, :-1, :, :])))

    stylized_output = jnp.transpose(stylized_nhwc, (0, 3, 1, 2))   # back to NCHW
    loss = {"loss_s": loss_s, "loss_c_fore": loss_c_fore,
            "loss_c_back": loss_c_back, "tv_loss": tv_loss}
    return loss, stylized_output


if __name__ == "__main__":
    key = jax.random.PRNGKey(0)
    kp, kc, ks, km = jax.random.split(key, 4)

    params = init_params(kp)
    content = jax.random.uniform(kc, (2, 3, 16, 16), jnp.float32)
    style = jax.random.uniform(ks, (2, 3, 16, 16), jnp.float32)
    mask = (jax.random.uniform(km, (2, 1, 16, 16)) > 0.5).astype(jnp.float32)

    loss, stylized_output = generator_forward(params, content, style, mask, alpha=1.0)
    jax.block_until_ready(stylized_output)
    jax.block_until_ready(loss)

    assert stylized_output.shape == (2, 3, 16, 16)
    for v in loss.values():
        assert bool(jnp.isfinite(v))
    print("KERNEL_OK")
</pallas_src>

<mosaic_0001>
module attributes {stable_mosaic.version = 11 : i64} {
  func.func @_conv_kernel(%arg0: i32, %arg1: i32, %arg2: memref<1x1x16x16x3xbf16, #tpu.memory_space<vmem>>, %arg3: memref<1x3x3xbf16, #tpu.memory_space<vmem>>, %arg4: memref<1x3xf32, #tpu.memory_space<vmem>>, %arg5: memref<1x1x16x16x3xf32, #tpu.memory_space<vmem>>) attributes {dimension_semantics = [#tpu.dimension_semantics<parallel>, #tpu.dimension_semantics<parallel>], iteration_bounds = array<i64: 2, 1>, scalar_prefetch = 0 : i64, scratch_operands = 0 : i64, tpu.core_type = #tpu.core_type<tc>, window_params = [{transform_indices = @transform_0, window_bounds = array<i64: 1, 1, 16, 16, 3>}, {pipeline_mode = #tpu.pipeline_mode<synchronous>, transform_indices = @transform_1, window_bounds = array<i64: 1, 3, 3>}, {pipeline_mode = #tpu.pipeline_mode<synchronous>, transform_indices = @transform_2, window_bounds = array<i64: 1, 3>}, {transform_indices = @transform_3, window_bounds = array<i64: 1, 1, 16, 16, 3>}]} {
    %c0 = arith.constant 0 : index
    %c0_0 = arith.constant 0 : index
    %c0_1 = arith.constant 0 : index
    %c0_2 = arith.constant 0 : index
    %c0_3 = arith.constant 0 : index
    %0 = vector.load %arg2[%c0, %c0_0, %c0_1, %c0_2, %c0_3] : memref<1x1x16x16x3xbf16, #tpu.memory_space<vmem>>, vector<1x1x16x16x3xbf16>
    %c0_4 = arith.constant 0 : index
    %c0_5 = arith.constant 0 : index
    %1 = vector.load %arg4[%c0_4, %c0_5] : memref<1x3xf32, #tpu.memory_space<vmem>>, vector<1x3xf32>
    %2 = vector.shape_cast %0 : vector<1x1x16x16x3xbf16> to vector<16x16x3xbf16>
    %3 = vector.shape_cast %2 : vector<16x16x3xbf16> to vector<256x3xbf16>
    %c0_6 = arith.constant 0 : index
    %c0_7 = arith.constant 0 : index
    %c0_8 = arith.constant 0 : index
    %4 = vector.load %arg3[%c0_6, %c0_7, %c0_8] : memref<1x3x3xbf16, #tpu.memory_space<vmem>>, vector<1x3x3xbf16>
    %5 = vector.shape_cast %4 : vector<1x3x3xbf16> to vector<3x3xbf16>
    %cst = arith.constant dense<0.000000e+00> : vector<256x3xf32>
    %6 = tpu.matmul %3, %5, %cst {dimension_numbers = #tpu.dot_dimension_numbers<[1], [0], [0], [1], [0, 0, 1, 1], [], []>} : vector<256x3xbf16>, vector<3x3xbf16>, vector<256x3xf32> -> vector<256x3xf32>
    %7 = vector.broadcast %1 : vector<1x3xf32> to vector<256x3xf32>
    %8 = arith.addf %6, %7 : vector<256x3xf32>
    %9 = vector.shape_cast %8 : vector<256x3xf32> to vector<1x1x16x16x3xf32>
    %c0_9 = arith.constant 0 : index
    %c0_10 = arith.constant 0 : index
    %c0_11 = arith.constant 0 : index
    %c0_12 = arith.constant 0 : index
    %c0_13 = arith.constant 0 : index
    %10 = vector.load %arg5[%c0_9, %c0_10, %c0_11, %c0_12, %c0_13] : memref<1x1x16x16x3xf32, #tpu.memory_space<vmem>>, vector<1x1x16x16x3xf32>
    tpu.vector_store %arg5[%c0_9, %c0_10, %c0_11, %c0_12, %c0_13], %9 {strides = array<i32>} : memref<1x1x16x16x3xf32, #tpu.memory_space<vmem>>, vector<1x1x16x16x3xf32>,
    return
  }
  func.func @transform_0(%arg0: i32, %arg1: i32) -> (i32, i32, i32, i32, i32) {
    %c0_i32 = arith.constant 0 : i32
    %c0_i32_0 = arith.constant 0 : i32
    %c0_i32_1 = arith.constant 0 : i32
    %c0_i32_2 = arith.constant 0 : i32
    return %arg0, %arg1, %c0_i32, %c0_i32_0, %c0_i32_1 : i32, i32, i32, i32, i32
  }
  func.func @transform_1(%arg0: i32, %arg1: i32) -> (i32, i32, i32) {
    %c0_i32 = arith.constant 0 : i32
    %c0_i32_0 = arith.constant 0 : i32
    %c0_i32_1 = arith.constant 0 : i32
    %c0_i32_2 = arith.constant 0 : i32
    return %c0_i32, %c0_i32_0, %c0_i32_1 : i32, i32, i32
  }
  func.func @transform_2(%arg0: i32, %arg1: i32) -> (i32, i32) {
    %c0_i32 = arith.constant 0 : i32
    %c0_i32_0 = arith.constant 0 : i32
    %c0_i32_1 = arith.constant 0 : i32
    return %c0_i32, %c0_i32_0 : i32, i32
  }
  func.func @transform_3(%arg0: i32, %arg1: i32) -> (i32, i32, i32, i32, i32) {
    %c0_i32 = arith.constant 0 : i32
    %c0_i32_0 = arith.constant 0 : i32
    %c0_i32_1 = arith.constant 0 : i32
    %c0_i32_2 = arith.constant 0 : i32
    return %arg0, %arg1, %c0_i32, %c0_i32_0, %c0_i32_1 : i32, i32, i32, i32, i32
  }
}

</mosaic_0001>

<bundles_post_ra>
// kernel: tpu_custom_call.1
= control target key start
LH: loop header
LB: loop body
LE: loop exit
PB: predicated region body
PF: predicated region fallthrough
CT: control target
= control target key end

     0   :  { %s854_s12 = smov 0   ;;  %s856_s13 = smov 0   ;;  %s1031_s0 = inlined_call_operand.vmem [shape: bf16[2,1,16,16,3], index: 0, kind: input, shape index: {}]   ;;  %s1032_s1 = inlined_call_operand.vmem [shape: bf16[1,3,3], index: 1, kind: input, shape index: {}]   ;;  %s1033_s2 = inlined_call_operand.vmem [shape: f32[1,3], index: 2, kind: input, shape index: {}]   ;;  %s1034_s3 = inlined_call_operand.vmem [shape: f32[2,1,16,16,3], index: 3, kind: output, shape index: {}]  }
   0x1   :  { %s858_s14 = smov 0  }
   0x2 LB: > { %s25_s15 = sadd.s32 1, %s827_s13  ;;  %p673_p0 = scmp.ge.s32.totalorder %s831_s14, 1  ;;  %s831_s14 = sphi %s858_s14, %s13_s14   ;;  %s827_s13 = sphi %s856_s13, %s1036_s13   ;;  %s823_s12 = sphi %s854_s12, %s1035_s12  }
   0x3   : > { %p27_p1 = scmp.ge.s32.totalorder %s25_s15, 2  ;;  %p157_p2 = scmp.lt.s32.totalorder %s831_s14, 3 }
   0x5   : > { %s1038_s15 = smov (%p27_p1, %s25_s15), 0  ;;  %p158_p3 = pnand %p673_p0, %p157_p2 }
   0x6   : > { %v241_v0 = vld [vmem:[%s1032_s1] sm:$0x3] (!%p158_p3)  ;;  %vm377_vm0 = vcmask (!%p158_p3), 1040384   ;;  %vm378_vm1 = vcmask (!%p158_p3), 1041408   ;;  %p189_p4 = scmp.lt.s32.totalorder (!%p158_p3), %s823_s12, 1  ;;  %v833_v1 = vmov (!%p158_p3), 65535  }
   0x7   : > { %161 = sbr.rel (%p158_p3) target bundleno = 262 (0x106), region = 32  ;;  %v379_v2 = vsel (!%p158_p3), %vm377_vm0, 4294967295, %v833_v1  ;;  %vm328_vm2 = vcmask (!%p158_p3), 23552   ;;  %v919_v21 = vld [vmem:[%s1033_s2] ss:$0 sm:$0xff] (!%p158_p3) }
   0x8   : > { %v380_v3 = vsel (!%p158_p3), %vm378_vm1, %v379_v2, 0 }
   0x9   : > { %v382_v4 = vand.u32 (!%p158_p3), %v380_v3, %v241_v0 }
   0xb   : > { %732 = vmatprep.subr.bf16.mxu0 (!%p158_p3), %v382_v4  ;;  %766 = vmatprep.subr.bf16.mxu1 (!%p158_p3), %v382_v4 }
   0xc   : > { %733 = vmatpush3.bf16.msra.mxu0 (!%p158_p3), %v382_v4  ;;  %767 = vmatpush3.bf16.msra.mxu1 (!%p158_p3), %v382_v4 }
   0xe   : > { %s1040_s12 = smov (!%p189_p4, %s823_s12), 1 }
   0xf   : > { %s713_s18 = sshll.u32 %s1040_s12, 7  ;;  %s714_s22 = sshll.u32 %s1040_s12, 8 }
  0x10   : > { %s881_s21 = scalar_lea.vmem %s1031_s0, %s713_s18  ;;  %s924_s27 = scalar_lea.vmem %s1034_s3, %s714_s22 }
  0x11   : > { %v793_v5 = vld [vmem:[%s881_s21] sm:$0xff]   ;;  %v795_v7 = vld [vmem:[%s881_s21 + $0x8] sm:$0xff]   ;;  %v797_v9 = vld [vmem:[%s881_s21 + $0x10] sm:$0xff]  }
  0x12   : > { %v794_v6 = vld [vmem:[%s881_s21 + $0x40] sm:$0xff]   ;;  %734 = vmatprep.mubr.msk.bf16.mxu0 %vm328_vm2, %v793_v5  ;;  %v796_v8 = vld [vmem:[%s881_s21 + $0x48] sm:$0xff]   ;;  %v798_v10 = vld [vmem:[%s881_s21 + $0x50] sm:$0xff]  }
  0x13   : > { %750 = vmatprep.mubr.msk.bf16.mxu1 %vm328_vm2, %v794_v6  ;;  %735 = vmatmul.mubr.msk.bf16.vlgmr.msra.gmra.mrb[0].mxu0 %vm328_vm2, %v795_v7  ;;  %v799_v11 = vld [vmem:[%s881_s21 + $0x18] sm:$0xff]   ;;  %v801_v13 = vld [vmem:[%s881_s21 + $0x20] sm:$0xff]   ;;  %v803_v15 = vld [vmem:[%s881_s21 + $0x28] sm:$0xff]  }
  0x14   : > { %751 = vmatmul.mubr.msk.bf16.vlgmr.msra.gmra.mrb[0].mxu1 %vm328_vm2, %v796_v8  ;;  %738 = vmatprep.mubr.msk.bf16.mxu0 %vm328_vm2, %v797_v9  ;;  %v800_v12 = vld [vmem:[%s881_s21 + $0x58] sm:$0xff]   ;;  %v802_v14 = vld [vmem:[%s881_s21 + $0x60] sm:$0xff]   ;;  %v804_v16 = vld [vmem:[%s881_s21 + $0x68] sm:$0xff]  }
  0x15   : > { %754 = vmatprep.mubr.msk.bf16.mxu1 %vm328_vm2, %v798_v10  ;;  %v805_v17 = vld [vmem:[%s881_s21 + $0x30] sm:$0xff]   ;;  %v807_v19 = vld [vmem:[%s881_s21 + $0x38] sm:$0xff]  }
  0x16   : > { %v806_v18 = vld [vmem:[%s881_s21 + $0x70] sm:$0xff]   ;;  %v808_v20 = vld [vmem:[%s881_s21 + $0x78] sm:$0xff]  }
  0x1b   : > { %739 = vmatmul.mubr.msk.bf16.gmra.mrb[4].mxu0 %vm328_vm2, %v799_v11 }
  0x1c   : > { %755 = vmatmul.mubr.msk.bf16.gmra.mrb[4].mxu1 %vm328_vm2, %v800_v12  ;;  %742 = vmatprep.mubr.msk.bf16.mxu0 %vm328_vm2, %v801_v13 }
  0x1d   : > { %758 = vmatprep.mubr.msk.bf16.mxu1 %vm328_vm2, %v802_v14 }
  0x23   : > { %743 = vmatmul.mubr.msk.bf16.gmra.mrb[8].mxu0 %vm328_vm2, %v803_v15 }
  0x24   : > { %759 = vmatmul.mubr.msk.bf16.gmra.mrb[8].mxu1 %vm328_vm2, %v804_v16  ;;  %746 = vmatprep.mubr.msk.bf16.mxu0 %vm328_vm2, %v805_v17 }
  0x25   : > { %762 = vmatprep.mubr.msk.bf16.mxu1 %vm328_vm2, %v806_v18 }
  0x2b   : > { %747 = vmatmul.mubr.msk.bf16.gmra.mrb[12].mxu0 %vm328_vm2, %v807_v19 }
  0x2c   : > { %763 = vmatmul.mubr.msk.bf16.gmra.mrb[12].mxu1 %vm328_vm2, %v808_v20 }
  0xe6   : > { %v736_v22 = vpop.f32.mrb[0].mxu0 }
  0xe7   : > { %v427_v23 = vadd.f32 %v736_v22, %v919_v21  ;;  %v752_v24 = vpop.f32.mrb[0].mxu1  ;;  %v418_v25 = vpop.f32.mrb[1].mxu0 }
  0xe8   : > { %v491_v26 = vadd.f32 %v752_v24, %v919_v21  ;;  %v419_v27 = vadd.f32 %v919_v21, %v418_v25  ;;  %v482_v28 = vpop.f32.mrb[1].mxu1  ;;  %v737_v29 = vpop.f32.mrb[2].mxu0 }
  0xe9   : > { %547 = vst.msk [vmem:[%s924_s27 + $0x10] sm:$0xff] %vm328_vm2, %v427_v23  ;;  %v483_v30 = vadd.f32 %v919_v21, %v482_v28  ;;  %v430_v31 = vadd.f32 %v737_v29, %v919_v21  ;;  %v753_v32 = vpop.f32.mrb[2].mxu1  ;;  %v421_v33 = vpop.f32.mrb[3].mxu0 }
  0xea   : > { %563 = vst.msk [vmem:[%s924_s27 + $0x90] sm:$0xff] %vm328_vm2, %v491_v26  ;;  %545 = vst.msk [vmem:[%s924_s27] sm:$0xff] %vm328_vm2, %v419_v27  ;;  %v494_v34 = vadd.f32 %v753_v32, %v919_v21  ;;  %v422_v35 = vadd.f32 %v919_v21, %v421_v33  ;;  %v485_v36 = vpop.f32.mrb[3].mxu1 }
  0xeb   : > { %561 = vst.msk [vmem:[%s924_s27 + $0x80] sm:$0xff] %vm328_vm2, %v483_v30  ;;  %548 = vst.msk [vmem:[%s924_s27 + $0x18] sm:$0xff] %vm328_vm2, %v430_v31  ;;  %v486_v37 = vadd.f32 %v919_v21, %v485_v36 }
  0xec   : > { %564 = vst.msk [vmem:[%s924_s27 + $0x98] sm:$0xff] %vm328_vm2, %v494_v34  ;;  %546 = vst.msk [vmem:[%s924_s27 + $0x8] sm:$0xff] %vm328_vm2, %v422_v35 }
  0xed   : > { %562 = vst.msk [vmem:[%s924_s27 + $0x88] sm:$0xff] %vm328_vm2, %v486_v37 }
  0xee   : > { %v740_v38 = vpop.f32.mrb[4].mxu0 }
  0xef   : > { %v443_v39 = vadd.f32 %v740_v38, %v919_v21  ;;  %v756_v40 = vpop.f32.mrb[4].mxu1  ;;  %v434_v41 = vpop.f32.mrb[5].mxu0 }
  0xf0   : > { %v507_v42 = vadd.f32 %v756_v40, %v919_v21  ;;  %v435_v43 = vadd.f32 %v919_v21, %v434_v41  ;;  %v498_v44 = vpop.f32.mrb[5].mxu1  ;;  %v741_v45 = vpop.f32.mrb[6].mxu0 }
  0xf1   : > { %551 = vst.msk [vmem:[%s924_s27 + $0x30] sm:$0xff] %vm328_vm2, %v443_v39  ;;  %v499_v46 = vadd.f32 %v919_v21, %v498_v44  ;;  %v446_v47 = vadd.f32 %v741_v45, %v919_v21  ;;  %v757_v48 = vpop.f32.mrb[6].mxu1  ;;  %v437_v49 = vpop.f32.mrb[7].mxu0 }
  0xf2   : > { %567 = vst.msk [vmem:[%s924_s27 + $0xb0] sm:$0xff] %vm328_vm2, %v507_v42  ;;  %549 = vst.msk [vmem:[%s924_s27 + $0x20] sm:$0xff] %vm328_vm2, %v435_v43  ;;  %v510_v50 = vadd.f32 %v757_v48, %v919_v21  ;;  %v438_v51 = vadd.f32 %v919_v21, %v437_v49  ;;  %v501_v52 = vpop.f32.mrb[7].mxu1 }
  0xf3   : > { %565 = vst.msk [vmem:[%s924_s27 + $0xa0] sm:$0xff] %vm328_vm2, %v499_v46  ;;  %552 = vst.msk [vmem:[%s924_s27 + $0x38] sm:$0xff] %vm328_vm2, %v446_v47  ;;  %v502_v53 = vadd.f32 %v919_v21, %v501_v52 }
  0xf4   : > { %568 = vst.msk [vmem:[%s924_s27 + $0xb8] sm:$0xff] %vm328_vm2, %v510_v50  ;;  %550 = vst.msk [vmem:[%s924_s27 + $0x28] sm:$0xff] %vm328_vm2, %v438_v51 }
  0xf5   : > { %566 = vst.msk [vmem:[%s924_s27 + $0xa8] sm:$0xff] %vm328_vm2, %v502_v53 }
  0xf6   : > { %v744_v54 = vpop.f32.mrb[8].mxu0 }
  0xf7   : > { %v459_v55 = vadd.f32 %v744_v54, %v919_v21  ;;  %v760_v56 = vpop.f32.mrb[8].mxu1  ;;  %v450_v57 = vpop.f32.mrb[9].mxu0 }
  0xf8   : > { %v523_v58 = vadd.f32 %v760_v56, %v919_v21  ;;  %v451_v59 = vadd.f32 %v919_v21, %v450_v57  ;;  %v514_v60 = vpop.f32.mrb[9].mxu1  ;;  %v745_v61 = vpop.f32.mrb[10].mxu0 }
  0xf9   : > { %555 = vst.msk [vmem:[%s924_s27 + $0x50] sm:$0xff] %vm328_vm2, %v459_v55  ;;  %v515_v62 = vadd.f32 %v919_v21, %v514_v60  ;;  %v462_v63 = vadd.f32 %v745_v61, %v919_v21  ;;  %v761_v0 = vpop.f32.mrb[10].mxu1  ;;  %v453_v1 = vpop.f32.mrb[11].mxu0 }
  0xfa   : > { %571 = vst.msk [vmem:[%s924_s27 + $0xd0] sm:$0xff] %vm328_vm2, %v523_v58  ;;  %553 = vst.msk [vmem:[%s924_s27 + $0x40] sm:$0xff] %vm328_vm2, %v451_v59  ;;  %v526_v2 = vadd.f32 %v761_v0, %v919_v21  ;;  %v454_v3 = vadd.f32 %v919_v21, %v453_v1  ;;  %v517_v4 = vpop.f32.mrb[11].mxu1 }
  0xfb   : > { %569 = vst.msk [vmem:[%s924_s27 + $0xc0] sm:$0xff] %vm328_vm2, %v515_v62  ;;  %556 = vst.msk [vmem:[%s924_s27 + $0x58] sm:$0xff] %vm328_vm2, %v462_v63  ;;  %v518_v5 = vadd.f32 %v919_v21, %v517_v4 }
  0xfc   : > { %572 = vst.msk [vmem:[%s924_s27 + $0xd8] sm:$0xff] %vm328_vm2, %v526_v2  ;;  %554 = vst.msk [vmem:[%s924_s27 + $0x48] sm:$0xff] %vm328_vm2, %v454_v3 }
  0xfd   : > { %570 = vst.msk [vmem:[%s924_s27 + $0xc8] sm:$0xff] %vm328_vm2, %v518_v5 }
  0xfe   : > { %v748_v6 = vpop.f32.mrb[12].mxu0 }
  0xff   : > { %v475_v7 = vadd.f32 %v748_v6, %v919_v21  ;;  %v764_v8 = vpop.f32.mrb[12].mxu1  ;;  %v466_v9 = vpop.f32.mrb[13].mxu0 }
 0x100   : > { %v539_v10 = vadd.f32 %v764_v8, %v919_v21  ;;  %v467_v11 = vadd.f32 %v919_v21, %v466_v9  ;;  %v530_v12 = vpop.f32.mrb[13].mxu1  ;;  %v749_v13 = vpop.f32.mrb[14].mxu0 }
 0x101   : > { %559 = vst.msk [vmem:[%s924_s27 + $0x70] sm:$0xff] %vm328_vm2, %v475_v7  ;;  %v531_v14 = vadd.f32 %v919_v21, %v530_v12  ;;  %v478_v15 = vadd.f32 %v749_v13, %v919_v21  ;;  %v765_v16 = vpop.f32.mrb[14].mxu1  ;;  %v469_v17 = vpop.f32.mrb[15].mxu0 }
 0x102   : > { %575 = vst.msk [vmem:[%s924_s27 + $0xf0] sm:$0xff] %vm328_vm2, %v539_v10  ;;  %557 = vst.msk [vmem:[%s924_s27 + $0x60] sm:$0xff] %vm328_vm2, %v467_v11  ;;  %v542_v18 = vadd.f32 %v765_v16, %v919_v21  ;;  %v470_v19 = vadd.f32 %v919_v21, %v469_v17  ;;  %v533_v20 = vpop.f32.mrb[15].mxu1 }
 0x103   : > { %573 = vst.msk [vmem:[%s924_s27 + $0xe0] sm:$0xff] %vm328_vm2, %v531_v14  ;;  %560 = vst.msk [vmem:[%s924_s27 + $0x78] sm:$0xff] %vm328_vm2, %v478_v15  ;;  %v534_v22 = vadd.f32 %v919_v21, %v533_v20 }
 0x104   : > { %576 = vst.msk [vmem:[%s924_s27 + $0xf8] sm:$0xff] %vm328_vm2, %v542_v18  ;;  %558 = vst.msk [vmem:[%s924_s27 + $0x68] sm:$0xff] %vm328_vm2, %v470_v19 }
 0x105   : > { %574 = vst.msk [vmem:[%s924_s27 + $0xe8] sm:$0xff] %vm328_vm2, %v534_v22 }
 0x106 PF: > { %s13_s14 = sadd.s32 1, %s831_s14   ;;  %s1035_s12 = smov %s827_s13 }
 0x107   : > { %p10_p5 = scmp.ge.s32.totalorder %s13_s14, 4   ;;  %s1036_s13 = smov %s1038_s15 }
 0x109   :  { %12 = sbr.rel (!%p10_p5) target bundleno = 2 (0x2), region = 62 }

</bundles_post_ra>
